<compile_context>
chip_gen: v5e
topology: v5e:2x2
jax: 0.10.0
libtpu: 0.0.40
codegen_flags: <defaults>
</compile_context>

<pallas_src>
import math
from functools import partial

import jax
import jax.numpy as jnp
from jax.experimental import pallas as pl
from jax.experimental.pallas import tpu as pltpu  # noqa: F401  (TPU backend assumed)


# ----------------------------- kernel ---------------------------------------

def embedding_gather_kernel(ids_ref, table_ref, o_ref, *, scale):
    """out = table[ids] * scale, done as a one-hot matmul on the MXU.

    ids_ref:   (BT, 1) int32   token ids
    table_ref: (V, D)  float32 embedding table (nn.Embedding weight)
    o_ref:     (BT, D) float32
    """
    ids = ids_ref[...]                                              # (BT, 1)
    bt = ids.shape[0]
    v = table_ref.shape[0]

    vocab_iota = jax.lax.broadcasted_iota(jnp.int32, (bt, v), 1)    # (BT, V)
    onehot = jnp.where(vocab_iota == ids, 1.0, 0.0)                 # f32 (BT, V)

    # fp32 contract precision keeps the lookup bit-exact (1.0 * x + 0.0 terms).
    gathered = jnp.dot(onehot, table_ref[...],
                       preferred_element_type=jnp.float32,
                       precision=jax.lax.Precision.HIGHEST)         # (BT, D)

    # Embeddings: lut(x) * sqrt(d_model), fused into the same kernel.
    o_ref[...] = gathered * scale


# ----------------------------- wrappers --------------------------------------

def embedding_lookup(text_ids, embed_table):
    """text_ids: (B, T) int32; embed_table: (V, D) f32  ->  (B, T, D) f32."""
    B, T = text_ids.shape
    V, D = embed_table.shape
    BT = B * T
    ids2d = text_ids.reshape(BT, 1).astype(jnp.int32)
    scale = float(math.sqrt(D))

    out = pl.pallas_call(
        partial(embedding_gather_kernel, scale=scale),
        out_shape=jax.ShapeDtypeStruct((BT, D), jnp.float32),
        grid=(1,),
        in_specs=[pl.BlockSpec((BT, 1), lambda i: (0, 0)),
                  pl.BlockSpec((V, D), lambda i: (0, 0))],
        out_specs=pl.BlockSpec((BT, D), lambda i: (0, 0)),
    )(ids2d, embed_table)
    return out.reshape(B, T, D)


def text_encoder_forward(input, text, tgt_mask, embed_table, is_train=True):
    """Mirrors Text_Encoder.forward with opt.Transformation == 'None'."""
    # TODO(synk): TPS_SpatialTransformerNetwork ('TPS' branch) is not provided in
    # the spec; the 'None' path leaves `input` unused, exactly as in the reference.
    # (make_feature_dim Linear exists in __init__ but is not used in forward.)
    del input, tgt_mask, is_train
    return embedding_lookup(text, embed_table)


# ----------------------------- main ------------------------------------------

if __name__ == "__main__":
    B, T = 2, 8          # batch, text length
    D_MODEL = 32         # opt.hidden_size
    VOCAB = 128          # opt.src_num_class

    key = jax.random.PRNGKey(0)
    k_tab, k_txt, k_img = jax.random.split(key, 3)

    embed_table = jax.random.normal(k_tab, (VOCAB, D_MODEL), jnp.float32)
    text = jax.random.randint(k_txt, (B, T), 0, VOCAB, dtype=jnp.int32)
    image = jax.random.normal(k_img, (B, 1, 32, 100), jnp.float32)   # unused ('Trans'=='None')

    out = text_encoder_forward(image, text, None, embed_table)
    out = jax.block_until_ready(out)

    assert out.shape == (B, T, D_MODEL) and out.dtype == jnp.float32
    assert bool(jnp.all(jnp.isfinite(out)))

    # Pure-JAX reference: Embeddings.forward == lut(x) * sqrt(d_model)
    ref = embed_table[text] * math.sqrt(D_MODEL)
    assert jnp.allclose(out, ref, rtol=1e-5, atol=1e-5), \
        float(jnp.max(jnp.abs(out - ref)))

    print("KERNEL_OK")
</pallas_src>

<mosaic_0001>
module attributes {stable_mosaic.version = 11 : i64} {
  func.func @embedding_gather_kernel(%arg0: i32, %arg1: memref<16x1xi32, #tpu.memory_space<vmem>>, %arg2: memref<128x32xf32, #tpu.memory_space<vmem>>, %arg3: memref<16x32xf32, #tpu.memory_space<vmem>>) attributes {dimension_semantics = [#tpu.dimension_semantics<arbitrary>], iteration_bounds = array<i64: 1>, scalar_prefetch = 0 : i64, scratch_operands = 0 : i64, tpu.core_type = #tpu.core_type<tc>, window_params = [{pipeline_mode = #tpu.pipeline_mode<synchronous>, transform_indices = @transform_0, window_bounds = array<i64: 16, 1>}, {pipeline_mode = #tpu.pipeline_mode<synchronous>, transform_indices = @transform_1, window_bounds = array<i64: 128, 32>}, {pipeline_mode = #tpu.pipeline_mode<synchronous>, transform_indices = @transform_2, window_bounds = array<i64: 16, 32>}]} {
    %c0 = arith.constant 0 : index
    %c0_0 = arith.constant 0 : index
    %0 = vector.load %arg1[%c0, %c0_0] : memref<16x1xi32, #tpu.memory_space<vmem>>, vector<16x1xi32>
    %1 = tpu.iota {dimensions = array<i32: 1>} : vector<16x128xi32>
    %2 = vector.broadcast %0 : vector<16x1xi32> to vector<16x128xi32>
    %3 = arith.cmpi eq, %1, %2 : vector<16x128xi32>
    %cst = arith.constant 1.000000e+00 : f32
    %cst_1 = arith.constant 0.000000e+00 : f32
    %4 = vector.broadcast %cst : f32 to vector<16x128xf32>
    %5 = vector.broadcast %cst_1 : f32 to vector<16x128xf32>
    %6 = arith.select %3, %4, %5 : vector<16x128xi1>, vector<16x128xf32>
    %c0_2 = arith.constant 0 : index
    %c0_3 = arith.constant 0 : index
    %7 = vector.load %arg2[%c0_2, %c0_3] : memref<128x32xf32, #tpu.memory_space<vmem>>, vector<128x32xf32>
    %cst_4 = arith.constant dense<0.000000e+00> : vector<16x32xf32>
    %8 = tpu.matmul %6, %7, %cst_4 {dimension_numbers = #tpu.dot_dimension_numbers<[1], [0], [0], [1], [0, 0, 1, 1], [], []>, precision = #tpu.contract_precision<fp32>} : vector<16x128xf32>, vector<128x32xf32>, vector<16x32xf32> -> vector<16x32xf32>
    %cst_5 = arith.constant 5.65685415 : f32
    %9 = vector.broadcast %cst_5 : f32 to vector<16x32xf32>
    %10 = arith.mulf %8, %9 : vector<16x32xf32>
    %c0_6 = arith.constant 0 : index
    %c0_7 = arith.constant 0 : index
    %11 = vector.load %arg3[%c0_6, %c0_7] : memref<16x32xf32, #tpu.memory_space<vmem>>, vector<16x32xf32>
    tpu.vector_store %arg3[%c0_6, %c0_7], %10 {strides = array<i32>} : memref<16x32xf32, #tpu.memory_space<vmem>>, vector<16x32xf32>,
    return
  }
  func.func @transform_0(%arg0: i32) -> (i32, i32) {
    %c0_i32 = arith.constant 0 : i32
    %c0_i32_0 = arith.constant 0 : i32
    %c0_i32_1 = arith.constant 0 : i32
    return %c0_i32, %c0_i32_0 : i32, i32
  }
  func.func @transform_1(%arg0: i32) -> (i32, i32) {
    %c0_i32 = arith.constant 0 : i32
    %c0_i32_0 = arith.constant 0 : i32
    %c0_i32_1 = arith.constant 0 : i32
    return %c0_i32, %c0_i32_0 : i32, i32
  }
  func.func @transform_2(%arg0: i32) -> (i32, i32) {
    %c0_i32 = arith.constant 0 : i32
    %c0_i32_0 = arith.constant 0 : i32
    %c0_i32_1 = arith.constant 0 : i32
    return %c0_i32, %c0_i32_0 : i32, i32
  }
}

</mosaic_0001>

<bundles_post_ra>
// kernel: tpu_custom_call.1
= control target key start
LH: loop header
LB: loop body
LE: loop exit
PB: predicated region body
PF: predicated region fallthrough
CT: control target
= control target key end

     0   :  { %v496_v2 = vmov 0   ;;  %s770_s0 = inlined_call_operand.vmem [shape: s32[16,1], index: 0, kind: input, shape index: {}]   ;;  %s771_s1 = inlined_call_operand.vmem [shape: f32[128,32], index: 1, kind: input, shape index: {}]   ;;  %s772_s2 = inlined_call_operand.hbm [shape: f32[16,32], index: 2, kind: output, shape index: {}]  }
   0x1   :  { %v12_v0 = vld [vmem:[%s770_s0] sm:$0xff]  ;;  %v41_v1 = vld [vmem:[%s771_s1 + $0x78] sm:$0xff]  ;;  %469 = vset.pattern.permute.xlu0 %v496_v2  ;;  %v40_v4 = vld [vmem:[%s771_s1 + $0x70] sm:$0xff] }
   0x2   :  { %v523_v3 = vand.u32 4294901760, %v41_v1  ;;  %v39_v5 = vld [vmem:[%s771_s1 + $0x68] sm:$0xff]  ;;  %v38_v6 = vld [vmem:[%s771_s1 + $0x60] sm:$0xff]  ;;  %17 = vperm.xlu0 %469, %v12_v0   ;;  %v534_v7 = vand.u32 4294901760, %v40_v4  ;;  %v37_v10 = vld [vmem:[%s771_s1 + $0x58] sm:$0xff] }
   0x3   :  { %v536_v8 = vand.u32 4294901760, %v39_v5  ;;  %v538_v9 = vand.u32 4294901760, %v38_v6  ;;  %v36_v11 = vld [vmem:[%s771_s1 + $0x50] sm:$0xff]  ;;  %v35_v12 = vld [vmem:[%s771_s1 + $0x48] sm:$0xff]  ;;  %v551_v14 = vand.u32 4294901760, %v37_v10  ;;  %v34_v17 = vld [vmem:[%s771_s1 + $0x40] sm:$0xff] }
   0x4   :  { %v90_v13 = vsub.f32 %v41_v1, %v523_v3  ;;  %250 = vmatpush.msra.mxu3 %v523_v3  ;;  %43 = vmatpush.msra.mxu0 %v523_v3  ;;  %v554_v15 = vand.u32 4294901760, %v36_v11  ;;  %v556_v16 = vand.u32 4294901760, %v35_v12  ;;  %v96_v18 = vsub.f32 %v40_v4, %v534_v7 }
   0x5   :  { %v102_v19 = vsub.f32 %v39_v5, %v536_v8  ;;  %v108_v20 = vsub.f32 %v38_v6, %v538_v9  ;;  %v564_v21 = vand.u32 4294901760, %v34_v17  ;;  %v114_v23 = vsub.f32 %v37_v10, %v551_v14 }
   0x6   :  { %v566_v22 = vand.u32 4294901760, %v90_v13  ;;  %194 = vmatpush.msra.mxu2 %v90_v13  ;;  %252 = vmatpush.msra.mxu3 %v534_v7  ;;  %v120_v24 = vsub.f32 %v36_v11, %v554_v15 }
   0x7   :  { %7 = vsyncpa [#allocation3], 0  ;;  %v571_v25 = vand.u32 4294901760, %v96_v18  ;;  %v573_v26 = vand.u32 4294901760, %v102_v19  ;;  %v575_v27 = vand.u32 4294901760, %v108_v20  ;;  %45 = vmatpush.msra.mxu0 %v534_v7  ;;  %v126_v28 = vsub.f32 %v35_v12, %v556_v16  ;;  %v13_v29 = vld [vmem:[%s770_s0 + $0x8] sm:$0xff] }
   0x8   :  { %v92_v30 = vsub.f32 %v90_v13, %v566_v22  ;;  %197 = vmatpush.msra.mxu2 %v96_v18  ;;  %v583_v31 = vand.u32 4294901760, %v114_v23  ;;  %254 = vmatpush.msra.mxu3 %v536_v8  ;;  %v132_v34 = vsub.f32 %v34_v17, %v564_v21  ;;  %v33_v35 = vld [vmem:[%s771_s1 + $0x38] sm:$0xff]  ;;  %v594_v38 = vand.u32 4294901760, %v120_v24  ;;  %v32_v39 = vld [vmem:[%s771_s1 + $0x30] sm:$0xff]  ;;  %v31_v40 = vld [vmem:[%s771_s1 + $0x28] sm:$0xff]  ;;  %s413_s19 = sshll.u32 %s772_s2, 4  ;;  %s414_s19 = int_to_ptr.hbm [resolvable:$true] %s413_s19 }
   0x9   :  { %v98_v32 = vsub.f32 %v96_v18, %v571_v25  ;;  %v104_v33 = vsub.f32 %v102_v19, %v573_v26  ;;  %47 = vmatpush.msra.mxu0 %v536_v8  ;;  %v110_v37 = vsub.f32 %v108_v20, %v575_v27  ;;  %v603_v42 = vand.u32 4294901760, %v126_v28  ;;  %v30_v43 = vld [vmem:[%s771_s1 + $0x20] sm:$0xff]  ;;  %v29_v50 = vld [vmem:[%s771_s1 + $0x18] sm:$0xff]  ;;  %v28_v57 = vld [vmem:[%s771_s1 + $0x10] sm:$0xff]  ;;  %s500_s20 = smov 128   ;;  %s501_s21 = smov 8  }
   0xa   :  { %v93_v36 = vand.u32 4294901760, %v92_v30  ;;  %200 = vmatpush.msra.mxu2 %v102_v19  ;;  %256 = vmatpush.msra.mxu3 %v538_v9  ;;  %v116_v45 = vsub.f32 %v114_v23, %v583_v31  ;;  %v610_v46 = vand.u32 4294901760, %v33_v35  ;;  %v613_v47 = vand.u32 4294901760, %v132_v34  ;;  %v27_v63 = vld [vmem:[%s771_s1 + $0x8] sm:$0xff]  ;;  %v26_v6 = vld [vmem:[%s771_s1] sm:$0xff]  ;;  %s499_s1 = smov [#allocation2]  }
   0xb   :  { %20 = vperm.xlu0 %469, %v13_v29   ;;  %v99_v41 = vand.u32 4294901760, %v98_v32  ;;  %49 = vmatpush.msra.mxu0 %v538_v9  ;;  %v105_v44 = vand.u32 4294901760, %v104_v33  ;;  %v616_v48 = vand.u32 4294901760, %v32_v39  ;;  %v618_v49 = vand.u32 4294901760, %v31_v40  ;;  %s411_s16 = sshll.u32 %s499_s1, 4  ;;  %s412_s16 = int_to_ptr.vmem [resolvable:$true] %s411_s16 }
   0xc   :  { %94 = vmatpush.msra.mxu1 %v93_v36  ;;  %203 = vmatpush.msra.mxu2 %v108_v20  ;;  %v111_v51 = vand.u32 4294901760, %v110_v37  ;;  %v122_v52 = vsub.f32 %v120_v24, %v594_v38  ;;  %v138_v53 = vsub.f32 %v33_v35, %v610_v46  ;;  %v625_v54 = vand.u32 4294901760, %v30_v43 }
   0xd   :  { %258 = vmatpush.msra.mxu3 %v551_v14  ;;  %51 = vmatpush.msra.mxu0 %v551_v14  ;;  %v128_v55 = vsub.f32 %v126_v28, %v603_v42  ;;  %v144_v56 = vsub.f32 %v32_v39, %v616_v48  ;;  %v117_v58 = vand.u32 4294901760, %v116_v45  ;;  %v150_v60 = vsub.f32 %v31_v40, %v618_v49 }
   0xe   :  { %100 = vmatpush.msra.mxu1 %v99_v41  ;;  %206 = vmatpush.msra.mxu2 %v114_v23  ;;  %v634_v59 = vand.u32 4294901760, %v138_v53  ;;  %v637_v61 = vand.u32 4294901760, %v29_v50  ;;  %v134_v62 = vsub.f32 %v132_v34, %v613_v47  ;;  %v123_v0 = vand.u32 4294901760, %v122_v52 }
   0xf   :  { %260 = vmatpush.msra.mxu3 %v554_v15  ;;  %53 = vmatpush.msra.mxu0 %v554_v15  ;;  %v645_v1 = vand.u32 4294901760, %v144_v56  ;;  %v156_v2 = vsub.f32 %v30_v43, %v625_v54  ;;  %v648_v4 = vand.u32 4294901760, %v28_v57  ;;  %v129_v5 = vand.u32 4294901760, %v128_v55 }
  0x10   :  { %106 = vmatpush.msra.mxu1 %v105_v44  ;;  %209 = vmatpush.msra.mxu2 %v120_v24  ;;  %v140_v10 = vsub.f32 %v138_v53, %v634_v59  ;;  %v656_v11 = vand.u32 4294901760, %v150_v60  ;;  %v162_v12 = vsub.f32 %v29_v50, %v637_v61  ;;  %v659_v13 = vand.u32 4294901760, %v27_v63 }
  0x11   :  { %262 = vmatpush.msra.mxu3 %v556_v16  ;;  %55 = vmatpush.msra.mxu0 %v556_v16  ;;  %v135_v17 = vand.u32 4294901760, %v134_v62  ;;  %v146_v18 = vsub.f32 %v144_v56, %v645_v1  ;;  %v664_v19 = vand.u32 4294901760, %v156_v2  ;;  %v168_v20 = vsub.f32 %v28_v57, %v648_v4 }
  0x12   :  { %112 = vmatpush.msra.mxu1 %v111_v51  ;;  %212 = vmatpush.msra.mxu2 %v126_v28  ;;  %v667_v23 = vand.u32 4294901760, %v26_v6  ;;  %v141_v24 = vand.u32 4294901760, %v140_v10  ;;  %v152_v28 = vsub.f32 %v150_v60, %v656_v11  ;;  %v672_v29 = vand.u32 4294901760, %v162_v12 }
  0x13   :  { %264 = vmatpush.msra.mxu3 %v564_v21  ;;  %57 = vmatpush.msra.mxu0 %v564_v21  ;;  %v174_v30 = vsub.f32 %v27_v63, %v659_v13  ;;  %v147_v32 = vand.u32 4294901760, %v146_v18  ;;  %v158_v33 = vsub.f32 %v156_v2, %v664_v19  ;;  %vm404_vm2 = vcmask 261120  }
  0x14   :  { %118 = vmatpush.msra.mxu1 %v117_v58  ;;  %215 = vmatpush.msra.mxu2 %v132_v34  ;;  %v678_v34 = vand.u32 4294901760, %v168_v20  ;;  %v180_v35 = vsub.f32 %v26_v6, %v667_v23  ;;  %v153_v36 = vand.u32 4294901760, %v152_v28  ;;  %v164_v37 = vsub.f32 %v162_v12, %v672_v29 }
  0x15   :  { %266 = vmatpush.msra.mxu3 %v610_v46  ;;  %59 = vmatpush.msra.mxu0 %v610_v46  ;;  %v684_v39 = vand.u32 4294901760, %v174_v30  ;;  %v159_v40 = vand.u32 4294901760, %v158_v33 }
  0x16   :  { %124 = vmatpush.msra.mxu1 %v123_v0  ;;  %218 = vmatpush.msra.mxu2 %v138_v53  ;;  %v170_v41 = vsub.f32 %v168_v20, %v678_v34  ;;  %v689_v43 = vand.u32 4294901760, %v180_v35  ;;  %v165_v44 = vand.u32 4294901760, %v164_v37 }
  0x17   :  { %268 = vmatpush.msra.mxu3 %v616_v48  ;;  %61 = vmatpush.msra.mxu0 %v616_v48  ;;  %v176_v45 = vsub.f32 %v174_v30, %v684_v39 }
  0x18   :  { %130 = vmatpush.msra.mxu1 %v129_v5  ;;  %221 = vmatpush.msra.mxu2 %v144_v56  ;;  %v171_v50 = vand.u32 4294901760, %v170_v41  ;;  %v182_v51 = vsub.f32 %v180_v35, %v689_v43 }
  0x19   :  { %270 = vmatpush.msra.mxu3 %v618_v49  ;;  %63 = vmatpush.msra.mxu0 %v618_v49  ;;  %v177_v52 = vand.u32 4294901760, %v176_v45 }
  0x1a   :  { %136 = vmatpush.msra.mxu1 %v135_v17  ;;  %224 = vmatpush.msra.mxu2 %v150_v60  ;;  %v183_v53 = vand.u32 4294901760, %v182_v51 }
  0x1b   :  { %272 = vmatpush.msra.mxu3 %v625_v54  ;;  %65 = vmatpush.msra.mxu0 %v625_v54 }
  0x1c   :  { %142 = vmatpush.msra.mxu1 %v141_v24  ;;  %227 = vmatpush.msra.mxu2 %v156_v2 }
  0x1d   :  { %274 = vmatpush.msra.mxu3 %v637_v61  ;;  %67 = vmatpush.msra.mxu0 %v637_v61 }
  0x1e   :  { %148 = vmatpush.msra.mxu1 %v147_v32  ;;  %230 = vmatpush.msra.mxu2 %v162_v12 }
  0x1f   :  { %276 = vmatpush.msra.mxu3 %v648_v4  ;;  %69 = vmatpush.msra.mxu0 %v648_v4 }
  0x20   :  { %154 = vmatpush.msra.mxu1 %v153_v36  ;;  %233 = vmatpush.msra.mxu2 %v168_v20 }
  0x21   :  { %278 = vmatpush.msra.mxu3 %v659_v13  ;;  %71 = vmatpush.msra.mxu0 %v659_v13 }
  0x22   :  { %160 = vmatpush.msra.mxu1 %v159_v40  ;;  %236 = vmatpush.msra.mxu2 %v174_v30 }
  0x23   :  { %280 = vmatpush.msra.mxu3 %v667_v23  ;;  %73 = vmatpush.msra.mxu0 %v667_v23 }
  0x24   :  { %166 = vmatpush.msra.mxu1 %v165_v44  ;;  %239 = vmatpush.msra.mxu2 %v180_v35 }
  0x25   :  { %447 = vmatpush.msrb.mxu3 %v523_v3  ;;  %295 = vmatpush.msrb.mxu0 %v566_v22 }
  0x26   :  { %431 = vmatpush.msrb.mxu2 %v566_v22  ;;  %172 = vmatpush.msra.mxu1 %v171_v50 }
  0x27   :  { %448 = vmatpush.msrb.mxu3 %v534_v7  ;;  %299 = vmatpush.msrb.mxu0 %v571_v25 }
  0x28   :  { %432 = vmatpush.msrb.mxu2 %v571_v25  ;;  %178 = vmatpush.msra.mxu1 %v177_v52 }
  0x29   :  { %449 = vmatpush.msrb.mxu3 %v536_v8  ;;  %303 = vmatpush.msrb.mxu0 %v573_v26 }
  0x2a   :  { %433 = vmatpush.msrb.mxu2 %v573_v26  ;;  %184 = vmatpush.msra.mxu1 %v183_v53 }
  0x2b   :  { %450 = vmatpush.msrb.mxu3 %v538_v9  ;;  %307 = vmatpush.msrb.mxu0 %v575_v27 }
  0x2c   :  { %364 = vmatpush.msrb.mxu1 %v523_v3  ;;  %434 = vmatpush.msrb.mxu2 %v575_v27  ;;  %v14_v3 = vlaneseq }
  0x2d   :  { %451 = vmatpush.msrb.mxu3 %v551_v14  ;;  %311 = vmatpush.msrb.mxu0 %v583_v31 }
  0x2e   :  { %366 = vmatpush.msrb.mxu1 %v534_v7  ;;  %435 = vmatpush.msrb.mxu2 %v583_v31  ;;  %v15_v7 = vand.u32 127, %v14_v3 }
  0x2f   :  { %452 = vmatpush.msrb.mxu3 %v554_v15  ;;  %315 = vmatpush.msrb.mxu0 %v594_v38 }
  0x30   :  { %368 = vmatpush.msrb.mxu1 %v536_v8  ;;  %436 = vmatpush.msrb.mxu2 %v594_v38 }
  0x31   :  { %453 = vmatpush.msrb.mxu3 %v556_v16  ;;  %319 = vmatpush.msrb.mxu0 %v603_v42 }
  0x32   :  { %370 = vmatpush.msrb.mxu1 %v538_v9  ;;  %437 = vmatpush.msrb.mxu2 %v603_v42  ;;  %v497_v9 = vmov 1.0  }
  0x33   :  { %454 = vmatpush.msrb.mxu3 %v564_v21  ;;  %323 = vmatpush.msrb.mxu0 %v613_v47 }
  0x34   :  { %372 = vmatpush.msrb.mxu1 %v551_v14  ;;  %438 = vmatpush.msrb.mxu2 %v613_v47  ;;  %v498_v14 = vmov 0.0  }
  0x35   :  { %455 = vmatpush.msrb.mxu3 %v610_v46  ;;  %327 = vmatpush.msrb.mxu0 %v634_v59 }
  0x36   :  { %374 = vmatpush.msrb.mxu1 %v554_v15  ;;  %439 = vmatpush.msrb.mxu2 %v634_v59 }
  0x37   :  { %456 = vmatpush.msrb.mxu3 %v616_v48  ;;  %331 = vmatpush.msrb.mxu0 %v645_v1 }
  0x38   :  { %376 = vmatpush.msrb.mxu1 %v556_v16  ;;  %440 = vmatpush.msrb.mxu2 %v645_v1 }
  0x39   :  { %457 = vmatpush.msrb.mxu3 %v618_v49  ;;  %335 = vmatpush.msrb.mxu0 %v656_v11 }
  0x3a   :  { %378 = vmatpush.msrb.mxu1 %v564_v21  ;;  %441 = vmatpush.msrb.mxu2 %v656_v11 }
  0x3b   :  { %458 = vmatpush.msrb.mxu3 %v625_v54  ;;  %339 = vmatpush.msrb.mxu0 %v664_v19 }
  0x3c   :  { %380 = vmatpush.msrb.mxu1 %v610_v46  ;;  %442 = vmatpush.msrb.mxu2 %v664_v19 }
  0x3d   :  { %459 = vmatpush.msrb.mxu3 %v637_v61  ;;  %343 = vmatpush.msrb.mxu0 %v672_v29 }
  0x3e   :  { %382 = vmatpush.msrb.mxu1 %v616_v48  ;;  %443 = vmatpush.msrb.mxu2 %v672_v29 }
  0x3f   :  { %460 = vmatpush.msrb.mxu3 %v648_v4  ;;  %347 = vmatpush.msrb.mxu0 %v678_v34 }
  0x40   :  { %384 = vmatpush.msrb.mxu1 %v618_v49  ;;  %444 = vmatpush.msrb.mxu2 %v678_v34 }
  0x41   :  { %461 = vmatpush.msrb.mxu3 %v659_v13  ;;  %351 = vmatpush.msrb.mxu0 %v684_v39 }
  0x42   :  { %386 = vmatpush.msrb.mxu1 %v625_v54  ;;  %445 = vmatpush.msrb.mxu2 %v684_v39 }
  0x43   :  { %462 = vmatpush.msrb.mxu3 %v667_v23  ;;  %355 = vmatpush.msrb.mxu0 %v689_v43 }
  0x44   :  { %388 = vmatpush.msrb.mxu1 %v637_v61  ;;  %446 = vmatpush.msrb.mxu2 %v689_v43 }
  0x46   :  { %390 = vmatpush.msrb.mxu1 %v648_v4 }
  0x48   :  { %392 = vmatpush.msrb.mxu1 %v659_v13 }
  0x4a   :  { %394 = vmatpush.msrb.mxu1 %v667_v23 }
  0x74   :  { %v18_v8 = vpop.permute.xlu0 %17 }
  0x75   :  { %vm22_vm0 = vcmp.eq.s32.totalorder %v15_v7, %v18_v8 }
  0x76   :  { %425 = vmatmul.msk.f32.vlgmr.msra.gmra.mxu1 %vm22_vm0, %v497_v9  ;;  %v24_v15 = vsel %vm22_vm0, 1.0, %v498_v14 }
  0x77   :  { %v74_v16 = vsub.f32 %v24_v15, %v24_v15 }
  0x79   :  { %241 = vmatmul.f32.vlgmr.msra.gmra.mxu2 %v74_v16  ;;  %v75_v21 = vand.u32 4294901760, %v74_v16 }
  0x7b   :  { %283 = vmatmul.f32.vlgmr.msra.gmra.mxu3 %v75_v21  ;;  %v76_v22 = vsub.f32 %v74_v16, %v75_v21 }
  0x7d   :  { %v21_v25 = vpop.permute.xlu0 %20  ;;  %v77_v26 = vand.u32 4294901760, %v76_v22 }
  0x7e   :  { %vm23_vm1 = vcmp.eq.s32.totalorder %v15_v7, %v21_v25 }
  0x7f   :  { %426 = vmatmul.msk.f32.gmra.mxu1 %vm23_vm1, %v497_v9  ;;  %v25_v27 = vsel %vm23_vm1, 1.0, %v498_v14  ;;  %78 = vmatmul.f32.vlgmr.msra.gmra.mxu0 %v77_v26 }
  0x80   :  { %v81_v31 = vsub.f32 %v25_v27, %v25_v27 }
  0x82   :  { %245 = vmatmul.f32.gmra.mxu2 %v81_v31  ;;  %v82_v38 = vand.u32 4294901760, %v81_v31 }
  0x84   :  { %288 = vmatmul.f32.gmra.mxu3 %v82_v38  ;;  %v83_v42 = vsub.f32 %v81_v31, %v82_v38 }
  0x86   :  { %v84_v46 = vand.u32 4294901760, %v83_v42 }
  0x87   :  { %429 = vmatmul.msk.f32.vlgmr.msrb.gmra.mxu1 %vm22_vm0, %v497_v9 }
  0x88   :  { %85 = vmatmul.f32.gmra.mxu0 %v84_v46 }
  0x8a   :  { %428 = vmatmul.msk.f32.vlgmr.msrb.gmra.mxu2 %vm23_vm1, %v497_v9 }
  0x8c   :  { %430 = vmatmul.msk.f32.vlgmr.msrb.gmra.mxu3 %vm23_vm1, %v497_v9 }
  0x90   :  { %427 = vmatmul.msk.f32.vlgmr.msrb.gmra.mxu0 %vm22_vm0, %v497_v9 }
  0xf3   :  { %v186_v47 = vpop.f32.mrf.mxu1 }
  0xfc   :  { %v79_v48 = vpop.f32.mrf.mxu0  ;;  %v242_v49 = vpop.f32.mrf.mxu2 }
  0xfd   :  { %v189_v55 = vpop.f32.mrf.mxu1  ;;  %v187_v56 = vadd.f32 %v186_v47, %v79_v48 }
  0xfe   :  { %v284_v54 = vpop.f32.mrf.mxu3 }
  0xff   :  { %v243_v61 = vadd.f32 %v242_v49, %v187_v56 }
 0x101   :  { %v285_v63 = vadd.f32 %v284_v54, %v243_v61 }
 0x105   :  { %v86_v57 = vpop.f32.mrf.mxu0  ;;  %v246_v58 = vpop.f32.mrf.mxu2 }
 0x106   :  { %v190_v59 = vadd.f32 %v189_v55, %v86_v57  ;;  %v396_v6 = vpop.f32.mrf.mxu1 }
 0x107   :  { %v289_v60 = vpop.f32.mrf.mxu3 }
 0x108   :  { %v247_v62 = vadd.f32 %v246_v58, %v190_v59 }
 0x10a   :  { %v290_v0 = vadd.f32 %v289_v60, %v247_v62 }
 0x10d   :  { %v357_v1 = vpop.f32.mrf.mxu0  ;;  %v360_v2 = vpop.f32.mrf.mxu2 }
 0x10e   :  { %v358_v4 = vadd.f32 %v357_v1, %v285_v63  ;;  %v361_v5 = vadd.f32 %v360_v2, %v290_v0 }
 0x10f   :  { %v399_v10 = vpop.f32.mrf.mxu3 }
 0x110   :  { %v397_v11 = vadd.f32 %v396_v6, %v358_v4  ;;  %v400_v12 = vadd.f32 %v399_v10, %v361_v5 }
 0x112   :  { %v402_v13 = vmul.f32 5.656854, %v397_v11  ;;  %v403_v17 = vmul.f32 5.656854, %v400_v12 }
 0x114   :  { %405 = vst.msk [vmem:[#allocation2] sm:$0xff] %vm404_vm2, %v402_v13 }
 0x115   :  { %406 = vst.msk [vmem:[#allocation2 + $0x8] sm:$0xff] %vm404_vm2, %v403_v17 }
 0x116   :  { %419 = dma.vmem_to_hbm [thread:$0]  %s412_s16, 256, %s414_s19, [#allocation3], %s500_s20, %s500_s20, %s501_s21  }
 0x117   :  { %494 = dma.done.wait [#allocation3], 256  }
 0x118   :  { %495 = vsyncadd [#allocation3], 4294967040 }
 0x119   :  { %424 = vsyncpa [#allocation3], 1 }

</bundles_post_ra>
